<compile_context>
chip_gen: v6e
topology: v6e:2x2x1
jax: 0.10.0
libtpu: 0.0.40
codegen_flags: <defaults>
</compile_context>

<pallas_src>
import numpy as np
import jax
import jax.numpy as jnp
from jax.experimental import pallas as pl
from jax.experimental.pallas import tpu as pltpu


# ----------------------------- config -------------------------------------- #
class ViTConfig:
    def __init__(self, d_model, image_res, patch_size):
        self.d_model = d_model
        self.image_res = image_res
        self.patch_size = patch_size
        im_h, im_w = image_res
        assert im_h % patch_size == 0 and im_w % patch_size == 0
        self.num_patches = (im_h // patch_size, im_w // patch_size)
        self.seq_length = self.num_patches[0] * self.num_patches[1] + 1


# ----------------------------- kernel --------------------------------------- #
def patch_embed_kernel(x_ref, w_ref, cls_ref, pos_ref, o_ref):
    # x_ref:   (Bt, N, P)  patched pixels for Bt images (compute dtype, e.g. bf16)
    # w_ref:   (P, D)      pre-transposed patch_embedding weight (compute dtype)
    # cls_ref: (1, D)      class embedding (f32)
    # pos_ref: (S, D)      position embedding (f32), S = N + 1
    # o_ref:   (Bt, S, D)  output embeddings (f32), [CLS] at seq position 0
    Bt, N, P = x_ref.shape
    S, D = pos_ref.shape

    # Batched MXU matmul, f32 accumulation.
    pe = jnp.einsum('bnp,pd->bnd', x_ref[...], w_ref[...],
                    preferred_element_type=jnp.float32)          # (Bt, N, D)

    # Fused position-embedding add, stored directly into the two output
    # regions — no in-kernel concatenate / sublane shift of the patch rows.
    pos_patches = pos_ref[pl.ds(1, N), :]                        # (N, D) f32
    o_ref[:, pl.ds(1, N), :] = (pe + pos_patches[None]).astype(o_ref.dtype)

    cls_row = cls_ref[...] + pos_ref[pl.ds(0, 1), :]             # (1, D) f32
    o_ref[:, pl.ds(0, 1), :] = jnp.broadcast_to(
        cls_row[None], (Bt, 1, D)).astype(o_ref.dtype)
    # TODO(synk): dropout is identity here (cfg.dropout == 0.0 / eval mode).


# ----------------------------- wrapper -------------------------------------- #
def patch_embedding_forward(pixel_values, patch_w, class_emb, pos_emb, cfg,
                            compute_dtype=jnp.bfloat16, block_b=None):
    B, C, H, W = pixel_values.shape
    ps = cfg.patch_size
    nph, npw = cfg.num_patches
    N = nph * npw                        # patches per image
    P = C * ps * ps                      # flattened patch dim
    D = cfg.d_model
    S = cfg.seq_length                   # N + 1

    # einops rearrange (pure layout plumbing, done once in plain JAX):
    # 'b c (nph ps_h) (npw ps_w) -> b (nph npw) (c ps_h ps_w)'
    # TODO(synk): this im2col is a separate HBM pass; could be folded into the
    # BlockSpec index_map for a truly memory-bound-optimal pipeline.
    x = pixel_values.reshape(B, C, nph, ps, npw, ps)
    x = x.transpose(0, 2, 4, 1, 3, 5).reshape(B, N, P)

    patched = x.astype(compute_dtype)
    w_t = jnp.transpose(patch_w).astype(compute_dtype)      # (P, D) pre-transposed
    cls_2d = class_emb.reshape(1, D).astype(jnp.float32)
    pos = pos_emb.astype(jnp.float32)

    # Batch-block size: biggest divisor of B whose double-buffered in/out
    # blocks stay well under the scoped-VMEM budget (conservative for v7x).
    if block_b is None:
        in_isz = np.dtype(compute_dtype).itemsize
        per_img = N * P * in_isz + S * D * 4                 # in + out bytes / image
        budget = 16 * 1024 * 1024
        max_bt = max(1, budget // (2 * per_img))             # 2x: double buffering
        block_b = 1
        for bt in range(1, B + 1):
            if B % bt == 0 and bt <= max_bt:
                block_b = bt
    Bt = block_b
    assert B % Bt == 0, (B, Bt)

    cost = pl.CostEstimate(
        flops=2 * B * N * P * D,
        transcendentals=0,
        bytes_accessed=(patched.size * patched.dtype.itemsize
                        + w_t.size * w_t.dtype.itemsize
                        + cls_2d.size * 4 + pos.size * 4
                        + B * S * D * 4),
    )

    out = pl.pallas_call(
        patch_embed_kernel,
        out_shape=jax.ShapeDtypeStruct((B, S, D), jnp.float32),
        grid_spec=pltpu.PrefetchScalarGridSpec(
            num_scalar_prefetch=0,
            grid=(B // Bt,),
            in_specs=[
                pl.BlockSpec((Bt, N, P), lambda b: (b, 0, 0)),
                pl.BlockSpec((P, D), lambda b: (0, 0)),      # block-invariant
                pl.BlockSpec((1, D), lambda b: (0, 0)),      # block-invariant
                pl.BlockSpec((S, D), lambda b: (0, 0)),      # block-invariant
            ],
            out_specs=pl.BlockSpec((Bt, S, D), lambda b: (b, 0, 0)),
        ),
        compiler_params=pltpu.CompilerParams(
            dimension_semantics=("parallel",),
            vmem_limit_bytes=32 * 1024 * 1024,
        ),
        cost_estimate=cost,
    )(patched, w_t, cls_2d, pos)
    return out


# ----------------------------- reference ------------------------------------ #
def patch_embedding_ref(pixel_values, patch_w, class_emb, pos_emb, cfg,
                        compute_dtype=jnp.bfloat16):
    B, C, H, W = pixel_values.shape
    ps = cfg.patch_size
    nph, npw = cfg.num_patches
    x = pixel_values.reshape(B, C, nph, ps, npw, ps)
    x = x.transpose(0, 2, 4, 1, 3, 5).reshape(B, nph * npw, C * ps * ps)
    pe = jnp.einsum('bsp,dp->bsd',
                    x.astype(compute_dtype), patch_w.astype(compute_dtype),
                    preferred_element_type=jnp.float32)
    cls = jnp.broadcast_to(class_emb[None, None, :].astype(jnp.float32),
                           (B, 1, cfg.d_model))
    emb = jnp.concatenate([cls, pe], axis=1)
    return emb + pos_emb[None].astype(jnp.float32)


# ----------------------------- main ----------------------------------------- #
if __name__ == "__main__":
    cfg = ViTConfig(d_model=32, image_res=(16, 16), patch_size=4)
    B, C = 2, 3                      # module hardcodes 3 input channels
    H, W = cfg.image_res
    P = 3 * cfg.patch_size ** 2      # 48
    S, D = cfg.seq_length, cfg.d_model

    key = jax.random.PRNGKey(0)
    k_x, k_w, k_cls, k_pos = jax.random.split(key, 4)

    pixel_values = jax.random.normal(k_x, (B, C, H, W), dtype=jnp.float32)
    patch_w = jax.random.normal(k_w, (D, P), dtype=jnp.float32) * 0.02
    class_emb = jax.random.normal(k_cls, (D,), dtype=jnp.float32) * 0.02
    pos_emb = jax.random.normal(k_pos, (S, D), dtype=jnp.float32) * 0.02

    out = patch_embedding_forward(pixel_values, patch_w, class_emb, pos_emb, cfg)
    out = jax.block_until_ready(out)

    ref = patch_embedding_ref(pixel_values, patch_w, class_emb, pos_emb, cfg)
    assert out.shape == (B, S, D), out.shape
    assert jnp.allclose(out, ref, atol=1e-4, rtol=1e-4), \
        float(jnp.max(jnp.abs(out - ref)))

    print("KERNEL_OK")
</pallas_src>

<mosaic_0001>
module attributes {stable_mosaic.version = 11 : i64} {
  func.func @patch_embed_kernel(%arg0: i32, %arg1: memref<2x16x48xbf16, #tpu.memory_space<vmem>>, %arg2: memref<48x32xbf16, #tpu.memory_space<vmem>>, %arg3: memref<1x32xf32, #tpu.memory_space<vmem>>, %arg4: memref<17x32xf32, #tpu.memory_space<vmem>>, %arg5: memref<2x17x32xf32, #tpu.memory_space<vmem>>) attributes {dimension_semantics = [#tpu.dimension_semantics<parallel>], iteration_bounds = array<i64: 1>, scalar_prefetch = 0 : i64, scratch_operands = 0 : i64, tpu.core_type = #tpu.core_type<tc>, window_params = [{transform_indices = @transform_0, window_bounds = array<i64: 2, 16, 48>}, {pipeline_mode = #tpu.pipeline_mode<synchronous>, transform_indices = @transform_1, window_bounds = array<i64: 48, 32>}, {pipeline_mode = #tpu.pipeline_mode<synchronous>, transform_indices = @transform_2, window_bounds = array<i64: 1, 32>}, {pipeline_mode = #tpu.pipeline_mode<synchronous>, transform_indices = @transform_3, window_bounds = array<i64: 17, 32>}, {transform_indices = @transform_4, window_bounds = array<i64: 2, 17, 32>}]} {
    %c0 = arith.constant 0 : index
    %c0_0 = arith.constant 0 : index
    %c0_1 = arith.constant 0 : index
    %0 = vector.load %arg1[%c0, %c0_0, %c0_1] : memref<2x16x48xbf16, #tpu.memory_space<vmem>>, vector<2x16x48xbf16>
    %c0_2 = arith.constant 0 : index
    %c0_3 = arith.constant 0 : index
    %1 = vector.load %arg2[%c0_2, %c0_3] : memref<48x32xbf16, #tpu.memory_space<vmem>>, vector<48x32xbf16>
    "tpu.trace_start"() <{level = 10 : i32, message = "bnp,pd->bnd"}> : () -> ()
    %cst = arith.constant dense<0.000000e+00> : vector<2x16x32xf32>
    %2 = tpu.matmul %0, %1, %cst {dimension_numbers = #tpu.dot_dimension_numbers<[2], [0], [0, 1], [1], [0, 0, 0, 1, 1, 1], [], []>} : vector<2x16x48xbf16>, vector<48x32xbf16>, vector<2x16x32xf32> -> vector<2x16x32xf32>
    "tpu.trace_stop"() : () -> ()
    %c1 = arith.constant 1 : index
    %c0_4 = arith.constant 0 : index
    %3 = vector.load %arg4[%c1, %c0_4] : memref<17x32xf32, #tpu.memory_space<vmem>>, vector<16x32xf32>
    %4 = vector.shape_cast %3 : vector<16x32xf32> to vector<1x16x32xf32>
    %5 = vector.broadcast %4 : vector<1x16x32xf32> to vector<2x16x32xf32>
    %6 = arith.addf %2, %5 : vector<2x16x32xf32>
    %c0_5 = arith.constant 0 : index
    %c1_6 = arith.constant 1 : index
    %c0_7 = arith.constant 0 : index
    %7 = vector.load %arg5[%c0_5, %c1_6, %c0_7] : memref<2x17x32xf32, #tpu.memory_space<vmem>>, vector<2x16x32xf32>
    tpu.vector_store %arg5[%c0_5, %c1_6, %c0_7], %6 {strides = array<i32>} : memref<2x17x32xf32, #tpu.memory_space<vmem>>, vector<2x16x32xf32>,
    %c0_8 = arith.constant 0 : index
    %c0_9 = arith.constant 0 : index
    %8 = vector.load %arg3[%c0_8, %c0_9] : memref<1x32xf32, #tpu.memory_space<vmem>>, vector<1x32xf32>
    %c0_10 = arith.constant 0 : index
    %c0_11 = arith.constant 0 : index
    %9 = vector.load %arg4[%c0_10, %c0_11] : memref<17x32xf32, #tpu.memory_space<vmem>>, vector<1x32xf32>
    %10 = arith.addf %8, %9 : vector<1x32xf32>
    %11 = vector.shape_cast %10 : vector<1x32xf32> to vector<1x1x32xf32>
    %12 = vector.shape_cast %11 : vector<1x1x32xf32> to vector<1x1x32xf32>
    %13 = vector.broadcast %12 : vector<1x1x32xf32> to vector<2x1x32xf32>
    %c0_12 = arith.constant 0 : index
    %c0_13 = arith.constant 0 : index
    %c0_14 = arith.constant 0 : index
    %14 = vector.load %arg5[%c0_12, %c0_13, %c0_14] : memref<2x17x32xf32, #tpu.memory_space<vmem>>, vector<2x1x32xf32>
    tpu.vector_store %arg5[%c0_12, %c0_13, %c0_14], %13 {strides = array<i32>} : memref<2x17x32xf32, #tpu.memory_space<vmem>>, vector<2x1x32xf32>,
    return
  }
  func.func @transform_0(%arg0: i32) -> (i32, i32, i32) {
    %c0_i32 = arith.constant 0 : i32
    %c0_i32_0 = arith.constant 0 : i32
    %c0_i32_1 = arith.constant 0 : i32
    return %arg0, %c0_i32, %c0_i32_0 : i32, i32, i32
  }
  func.func @transform_1(%arg0: i32) -> (i32, i32) {
    %c0_i32 = arith.constant 0 : i32
    %c0_i32_0 = arith.constant 0 : i32
    %c0_i32_1 = arith.constant 0 : i32
    return %c0_i32, %c0_i32_0 : i32, i32
  }
  func.func @transform_2(%arg0: i32) -> (i32, i32) {
    %c0_i32 = arith.constant 0 : i32
    %c0_i32_0 = arith.constant 0 : i32
    %c0_i32_1 = arith.constant 0 : i32
    return %c0_i32, %c0_i32_0 : i32, i32
  }
  func.func @transform_3(%arg0: i32) -> (i32, i32) {
    %c0_i32 = arith.constant 0 : i32
    %c0_i32_0 = arith.constant 0 : i32
    %c0_i32_1 = arith.constant 0 : i32
    return %c0_i32, %c0_i32_0 : i32, i32
  }
  func.func @transform_4(%arg0: i32) -> (i32, i32, i32) {
    %c0_i32 = arith.constant 0 : i32
    %c0_i32_0 = arith.constant 0 : i32
    %c0_i32_1 = arith.constant 0 : i32
    return %arg0, %c0_i32, %c0_i32_0 : i32, i32, i32
  }
}

</mosaic_0001>

<bundles_post_ra>
// kernel: tpu_custom_call.1
= control target key start
LH: loop header
LB: loop body
LE: loop exit
PB: predicated region body
PF: predicated region fallthrough
CT: control target
= control target key end

     0   :  { %vm58_vm0 = vcmask 392192   ;;  %vm122_vm1 = vcmask 253952   ;;  %vm114_vm2 = vcmask 261120   ;;  %s226_s1 = inlined_call_operand.vmem [shape: bf16[48,32], index: 1, kind: input, shape index: {}]   ;;  %s227_s0 = inlined_call_operand.vmem [shape: bf16[2,16,48], index: 0, kind: input, shape index: {}]   ;;  %s228_s2 = inlined_call_operand.vmem [shape: f32[1,32], index: 2, kind: input, shape index: {}]   ;;  %s229_s3 = inlined_call_operand.vmem [shape: f32[17,32], index: 3, kind: input, shape index: {}]   ;;  %s230_s4 = inlined_call_operand.vmem [shape: f32[2,17,32], index: 4, kind: output, shape index: {}]  }
   0x1   :  { %v151_v0 = vld [vmem:[%s226_s1 + $0x10] sm:$0xff]   ;;  %v152_v1 = vld [vmem:[%s226_s1 + $0x8] sm:$0xff]   ;;  %v154_v2 = vld [vmem:[%s227_s0] sm:$0xff]  }
   0x2   :  { %141 = vmatprep.subr.bf16.mxu0 %v151_v0  ;;  %v153_v3 = vld [vmem:[%s226_s1] sm:$0xff]   ;;  %147 = vmatprep.mubr.msk.bf16.mxu0 %vm58_vm0, %v154_v2  ;;  %v155_v4 = vld [vmem:[%s227_s0 + $0x8] sm:$0xff]  }
   0x3   :  { %142 = vmatpush3.bf16.msra.mxu0 %v151_v0  ;;  %v119_v5 = vld [vmem:[%s228_s2] sm:$0x1]  ;;  %v28_v8 = vld [vmem:[%s229_s3 + $0x1] sm:$0xff]  ;;  %v29_v12 = vld [vmem:[%s229_s3 + $0x9] sm:$0xff] }
   0x4   :  { %143 = vmatprep.subr.bf16.mxu0 %v152_v1  ;;  %v120_v6 = vld [vmem:[%s229_s3] sm:$0x1] }
   0x5   :  { %v121_v7 = vadd.f32 %v120_v6, %v119_v5 }
   0x7   :  { %144 = vmatpush3.bf16.msra.mxu0 %v152_v1  ;;  %123 = vst.msk [vmem:[%s230_s4] sm:$0x1] %vm122_vm1, %v121_v7  ;;  %124 = vst.msk [vmem:[%s230_s4 + $0x18] sm:$0x1] %vm122_vm1, %v121_v7 }
   0x8   :  { %145 = vmatprep.subr.bf16.mxu0 %v153_v3 }
   0xb   :  { %146 = vmatpush3.bf16.msra.mxu0 %v153_v3 }
   0xe   :  { %148 = vmatmul.mubr.msk.bf16.vlgmr.msra.gmra.mxu0 %vm58_vm0, %v155_v4 }
  0xce   :  { %v149_v9 = vpop.f32.mrf.mxu0 }
  0xcf   :  { %v108_v10 = vadd.f32 %v149_v9, %v28_v8 }
  0xd0   :  { %v99_v11 = vpop.f32.mrf.mxu0 }
  0xd1   :  { %117 = vst.msk [vmem:[%s230_s4 + $0x19] sm:$0xff] %vm114_vm2, %v108_v10  ;;  %v100_v13 = vadd.f32 %v99_v11, %v28_v8 }
  0xd2   :  { %v150_v14 = vpop.f32.mrf.mxu0 }
  0xd3   :  { %115 = vst.msk [vmem:[%s230_s4 + $0x1] sm:$0xff] %vm114_vm2, %v100_v13  ;;  %v111_v15 = vadd.f32 %v150_v14, %v29_v12 }
  0xd4   :  { %v102_v16 = vpop.f32.mrf.mxu0 }
  0xd5   :  { %118 = vst.msk [vmem:[%s230_s4 + $0x21] sm:$0xff] %vm114_vm2, %v111_v15  ;;  %v103_v17 = vadd.f32 %v102_v16, %v29_v12 }
  0xd7   :  { %116 = vst.msk [vmem:[%s230_s4 + $0x9] sm:$0xff] %vm114_vm2, %v103_v17 }

</bundles_post_ra>
